<compile_context>
chip_gen: v5e
topology: v5e:2x2
jax: 0.10.0
libtpu: 0.0.40
codegen_flags: <defaults>
</compile_context>

<pallas_src>
import math

import jax
import jax.numpy as jnp
import numpy as np
from jax.experimental import pallas as pl
from jax.experimental.pallas import tpu as pltpu

_LANES = 128
_SUBLANES = 8
_X_TILE_BYTES = 2 << 20   # target bytes for one (bt, rt, 128) x/out block


def _add_pe_kernel(x_ref, pe_ref, o_ref):
    # x_ref: (bt, rt, 128), pe_ref: (rt, 128) -> broadcast add over batch.
    o_ref[...] = x_ref[...] + pe_ref[...]


def _round_up(v, m):
    return (v + m - 1) // m * m


def _largest_divisor(n, max_val, multiple_of=1):
    """Largest divisor of n that is <= max_val and a multiple of `multiple_of`.
    Returns None when no such divisor exists."""
    best = None
    d = 1
    while d * d <= n:
        if n % d == 0:
            for c in (d, n // d):
                if c <= max_val and c % multiple_of == 0:
                    if best is None or c > best:
                        best = c
        d += 1
    return best


def positional_encoding_pallas(x, pe, *, return_vec=False):
    """x: (B, L, D), pe: (L, D).  Returns dropout(x + pe) with dropout =
    identity (eval mode), matching the PyTorch forward."""
    if return_vec:
        return pe  # forward() just returns the buffer; no kernel needed.

    B, L, D = x.shape
    assert pe.shape == (L, D), "module adds the full pe table (seq == max_len)"
    itemsize = jnp.dtype(x.dtype).itemsize

    # ---- lane-dense layout --------------------------------------------------
    # Fold (L, D) row-major into (rows, 128).  If L*D isn't a multiple of 128,
    # zero-pad the flattened axis (x and pe identically) up to a multiple of
    # 128*8 so rows is also sublane-friendly; pad is sliced off afterwards.
    flat = L * D
    padded = flat if flat % _LANES == 0 else _round_up(flat, _LANES * _SUBLANES)
    rows = padded // _LANES

    # ---- tile selection (VMEM-budgeted) -------------------------------------
    row_bytes = _LANES * itemsize
    rt_max = max(1, _X_TILE_BYTES // row_bytes)
    # Row-tile must be a multiple of 8 (sublane rule) unless it equals `rows`.
    rt = _largest_divisor(rows, rt_max, multiple_of=_SUBLANES)
    if rt is None:
        rt = rows  # full-dim block is always layout-legal
    bt_max = max(1, _X_TILE_BYTES // (rt * row_bytes))
    bt = _largest_divisor(B, bt_max) or 1

    grid = (rows // rt, B // bt)  # rows outer, batch inner (pe fetched once/tile)

    # Real VMEM footprint: double-buffered x, out and pe blocks, plus headroom.
    x_tile_bytes = bt * rt * row_bytes
    pe_tile_bytes = rt * row_bytes
    footprint = 2 * x_tile_bytes + 2 * x_tile_bytes + 2 * pe_tile_bytes
    vmem_limit = int(min(max(2 * footprint, 16 << 20), 32 << 20))

    # ---- prepare lane-dense operands ----------------------------------------
    x2 = x.reshape(B, flat)
    pe2 = pe.reshape(flat)
    if padded != flat:
        x2 = jnp.pad(x2, ((0, 0), (0, padded - flat)))
        pe2 = jnp.pad(pe2, (0, padded - flat))
    x2 = x2.reshape(B, rows, _LANES)
    pe2 = pe2.reshape(rows, _LANES)

    out = pl.pallas_call(
        _add_pe_kernel,
        out_shape=jax.ShapeDtypeStruct((B, rows, _LANES), x.dtype),
        grid=grid,
        in_specs=[
            pl.BlockSpec((bt, rt, _LANES), lambda ri, bi: (bi, ri, 0)),
            pl.BlockSpec((rt, _LANES), lambda ri, bi: (ri, 0)),  # shared pe tile
        ],
        out_specs=pl.BlockSpec((bt, rt, _LANES), lambda ri, bi: (bi, ri, 0)),
        input_output_aliases={0: 0},  # x2 buffer reused for the output
        compiler_params=pltpu.CompilerParams(
            dimension_semantics=("parallel", "parallel"),
            vmem_limit_bytes=vmem_limit),
    )(x2, pe2)

    out = out.reshape(B, padded)
    if padded != flat:
        out = out[:, :flat]
    return out.reshape(B, L, D)


def make_positional_encoding_table(d_model, max_len):
    """Host-side constant, identical to the PyTorch buffer construction."""
    position = np.arange(max_len, dtype=np.float32)[:, None]
    div_term = np.exp(np.arange(0, d_model, 2, dtype=np.float32)
                      * (-math.log(10000.0) / d_model))
    pe = np.zeros((max_len, d_model), dtype=np.float32)
    pe[:, 0::2] = np.sin(position * div_term)
    pe[:, 1::2] = np.cos(position * div_term)
    return jnp.asarray(pe)


if __name__ == "__main__":
    # Small deterministic config.  The module adds the *entire* pe buffer,
    # so seq_len must equal max_len; we build the table with max_len = L.
    B, L, d_model = 2, 8, 32
    max_len = L

    pe = make_positional_encoding_table(d_model, max_len)

    key = jax.random.PRNGKey(0)
    x = jax.random.normal(key, (B, L, d_model), jnp.float32)

    fwd = jax.jit(lambda xx, pp: positional_encoding_pallas(xx, pp))
    out = jax.block_until_ready(fwd(x, pe))

    # Pure-JAX reference mirroring the PyTorch forward (dropout = identity).
    ref = jax.block_until_ready(x + pe[None, :, :])
    np.testing.assert_allclose(np.asarray(out), np.asarray(ref),
                               rtol=1e-6, atol=1e-6)

    # return_vec=True path (no kernel; forward just returns the buffer).
    vec = jax.block_until_ready(
        positional_encoding_pallas(x, pe, return_vec=True))
    np.testing.assert_allclose(np.asarray(vec), np.asarray(pe))

    print("KERNEL_OK")
</pallas_src>

<mosaic_0001>
module attributes {stable_mosaic.version = 11 : i64} {
  func.func @_add_pe_kernel(%arg0: i32, %arg1: i32, %arg2: memref<2x2x128xf32, #tpu.memory_space<vmem>>, %arg3: memref<2x128xf32, #tpu.memory_space<vmem>>, %arg4: memref<2x2x128xf32, #tpu.memory_space<vmem>>) attributes {dimension_semantics = [#tpu.dimension_semantics<parallel>, #tpu.dimension_semantics<parallel>], iteration_bounds = array<i64: 1, 1>, scalar_prefetch = 0 : i64, scratch_operands = 0 : i64, tpu.core_type = #tpu.core_type<tc>, window_params = [{transform_indices = @transform_0, window_bounds = array<i64: 2, 2, 128>}, {transform_indices = @transform_1, window_bounds = array<i64: 2, 128>}, {transform_indices = @transform_2, window_bounds = array<i64: 2, 2, 128>}]} {
    %c0 = arith.constant 0 : index
    %c0_0 = arith.constant 0 : index
    %c0_1 = arith.constant 0 : index
    %0 = vector.load %arg2[%c0, %c0_0, %c0_1] : memref<2x2x128xf32, #tpu.memory_space<vmem>>, vector<2x2x128xf32>
    %c0_2 = arith.constant 0 : index
    %c0_3 = arith.constant 0 : index
    %1 = vector.load %arg3[%c0_2, %c0_3] : memref<2x128xf32, #tpu.memory_space<vmem>>, vector<2x128xf32>
    %2 = vector.shape_cast %1 : vector<2x128xf32> to vector<1x2x128xf32>
    %3 = vector.broadcast %2 : vector<1x2x128xf32> to vector<2x2x128xf32>
    %4 = arith.addf %0, %3 : vector<2x2x128xf32>
    %c0_4 = arith.constant 0 : index
    %c0_5 = arith.constant 0 : index
    %c0_6 = arith.constant 0 : index
    %5 = vector.load %arg4[%c0_4, %c0_5, %c0_6] : memref<2x2x128xf32, #tpu.memory_space<vmem>>, vector<2x2x128xf32>
    tpu.vector_store %arg4[%c0_4, %c0_5, %c0_6], %4 {strides = array<i32>} : memref<2x2x128xf32, #tpu.memory_space<vmem>>, vector<2x2x128xf32>,
    return
  }
  func.func @transform_0(%arg0: i32, %arg1: i32) -> (i32, i32, i32) {
    %c0_i32 = arith.constant 0 : i32
    %c0_i32_0 = arith.constant 0 : i32
    return %arg1, %arg0, %c0_i32 : i32, i32, i32
  }
  func.func @transform_1(%arg0: i32, %arg1: i32) -> (i32, i32) {
    %c0_i32 = arith.constant 0 : i32
    %c0_i32_0 = arith.constant 0 : i32
    return %arg0, %c0_i32 : i32, i32
  }
  func.func @transform_2(%arg0: i32, %arg1: i32) -> (i32, i32, i32) {
    %c0_i32 = arith.constant 0 : i32
    %c0_i32_0 = arith.constant 0 : i32
    return %arg1, %arg0, %c0_i32 : i32, i32, i32
  }
}

</mosaic_0001>

<bundles_post_ra>
// kernel: _lambda_.1
= control target key start
LH: loop header
LB: loop body
LE: loop exit
PB: predicated region body
PF: predicated region fallthrough
CT: control target
= control target key end

     0   :  { %s52_s0 = inlined_call_operand.vmem [shape: f32[2,2,128], index: 0, kind: input, shape index: {}, may-alias: {0,2}]   ;;  %s53_s1 = inlined_call_operand.vmem [shape: f32[2,128], index: 1, kind: input, shape index: {}]   ;;  %s54_s2 = inlined_call_operand.vmem [shape: f32[2,2,128], index: 2, kind: output, shape index: {}, may-alias: {0,2}]  }
   0x1   :  { %v11_v0 = vld [vmem:[%s52_s0] sm:$0x3]  ;;  %v12_v2 = vld [vmem:[%s52_s0 + $0x2] sm:$0x3] }
   0x2   :  { %v13_v1 = vld [vmem:[%s53_s1] sm:$0x3] }
   0x3   :  { %v14_v3 = vadd.f32 %v13_v1, %v11_v0  ;;  %v15_v4 = vadd.f32 %v13_v1, %v12_v2 }
   0x5   :  { %16 = vst [vmem:[%s54_s2] sm:$0x3] %v14_v3 }
   0x6   :  { %17 = vst [vmem:[%s54_s2 + $0x2] sm:$0x3] %v15_v4 }

</bundles_post_ra>
